<compile_context>
chip_gen: v5e
topology: v5e:2x2
jax: 0.10.0
libtpu: 0.0.40
codegen_flags: <defaults>
</compile_context>

<pallas_src>
import jax
import jax.numpy as jnp
from jax.experimental import pallas as pl
from jax.experimental.pallas import tpu as pltpu

_EPS = 1e-5      # nn.BatchNorm1d default eps
_SLOPE = 0.2     # LeakyReLU negative slope

_VMEM = pl.BlockSpec(memory_space=pltpu.MemorySpace.VMEM)


# ------------------------------ in-kernel math ------------------------------ #

def _leaky(y):
    return jnp.where(y >= 0, y, _SLOPE * y)


def _bn(y, g, b):
    """Training-mode BatchNorm1d, single pass: biased batch stats over rows
    (rows = batch * length, exactly M — no padded rows ever enter this)."""
    inv_m = 1.0 / y.shape[0]
    mean = jnp.sum(y, axis=0, keepdims=True) * inv_m
    ex2 = jnp.sum(y * y, axis=0, keepdims=True) * inv_m
    var = ex2 - mean * mean
    return (y - mean) * jax.lax.rsqrt(var + _EPS) * g + b


def _res_block_body(xp_ref, w1cat, w2cat, bn_a, bn_b, batch, l_out, c_out):
    """One ResidualBlock, fully in-kernel.

    xp_ref : VMEM ref [batch*2*l_out + 2, c_in] f32 — block input, channels-last,
             rows ordered (batch, length), one zero row of padding at each end.
    w1cat  : [4*c_in, 2*c_out] bf16 — [conv1 | shortcut] weights (tap-major rows).
    w2cat  : [4*c_out, c_out]  bf16 — conv2 weights (tap-major rows).
    bn_a   : [2, 2*c_out] f32 — [gamma1|gamma_sc ; beta1|beta_sc].
    bn_b   : [2, c_out]   f32 — [gamma2 ; beta2].
    Returns the block output as a value [batch*l_out, c_out] f32.
    """
    m = batch * l_out
    # position-in-sequence of every output row (rows are (batch, length) ordered)
    l_idx = jax.lax.broadcasted_iota(jnp.int32, (m, 1), 0) % l_out

    # --- conv1 + shortcut conv (k=4, stride 2, pad 1): stride-2 taps via strided
    #     pl.ds reads of the padded input ref; masks implement the conv zero
    #     padding and keep batches from bleeding into each other. ---
    taps = []
    for d in (-1, 0, 1, 2):
        t = xp_ref[pl.ds(1 + d, m, stride=2), :]
        if d == -1:
            t = jnp.where(l_idx == 0, jnp.zeros_like(t), t)
        elif d == 2:
            t = jnp.where(l_idx == l_out - 1, jnp.zeros_like(t), t)
        taps.append(t)
    patches = jnp.concatenate(taps, axis=1).astype(jnp.bfloat16)       # [m, 4*c_in]

    # one MXU pass covers conv1 and the shortcut conv; their BNs share one
    # single-pass stats reduction over the lane-concatenated [m, 2*c_out] result.
    y = jnp.dot(patches, w1cat, preferred_element_type=jnp.float32)    # [m, 2*c_out]
    y = _bn(y, bn_a[0:1, :], bn_a[1:2, :])
    r = _leaky(y[:, :c_out])        # residual branch: BN + LeakyReLU
    sc = y[:, c_out:]               # shortcut branch: BN only

    # --- ConstantPad1d((0,1),0) + conv2 (k=4, stride 1, pad 1): stride-1 taps via
    #     XLU sublane rolls + VPU masks (no O(M^2) shift matrices). r is treated
    #     as zero outside [0, l_out) which reproduces both paddings exactly. ---
    taps2 = []
    for d in (-1, 0, 1, 2):
        if d == 0:
            taps2.append(r)
        else:
            t = pltpu.roll(r, shift=(-d) % m, axis=0)
            valid = jnp.logical_and(l_idx + d >= 0, l_idx + d < l_out)
            taps2.append(jnp.where(valid, t, jnp.zeros_like(t)))
    patches2 = jnp.concatenate(taps2, axis=1).astype(jnp.bfloat16)     # [m, 4*c_out]

    y2 = jnp.dot(patches2, w2cat, preferred_element_type=jnp.float32)  # [m, c_out]
    y2 = _bn(y2, bn_b[0:1, :], bn_b[1:2, :])

    return _leaky(y2 + sc)


def _make_disc_kernel(batch, l0, channels):
    """Builds the single fused forward kernel for the given static config."""
    n_blocks = len(channels)
    lengths = []
    l = l0
    for _ in channels:
        l //= 2
        lengths.append(l)

    def kernel(*refs):
        n_in = 1 + 4 * n_blocks + 2
        in_refs = refs[:n_in]
        o_ref = refs[n_in]
        scratch_refs = refs[n_in + 1:]

        xp_ref = in_refs[0]
        wf_ref = in_refs[1 + 4 * n_blocks]      # [M_last, c_last] f32
        gsel_ref = in_refs[2 + 4 * n_blocks]    # [batch, M_last] f32 (0/1)

        in_ref = xp_ref
        act = None
        for i in range(n_blocks):
            w1cat = in_refs[1 + 4 * i][...]
            w2cat = in_refs[2 + 4 * i][...]
            bn_a = in_refs[3 + 4 * i][...]
            bn_b = in_refs[4 + 4 * i][...]
            c_out = channels[i]
            l_out = lengths[i]
            act = _res_block_body(in_ref, w1cat, w2cat, bn_a, bn_b,
                                  batch, l_out, c_out)
            if i + 1 < n_blocks:
                # park this block's output in a VMEM scratch ref (with one zero
                # pad row at each end) so the next block can read its stride-2
                # taps with strided pl.ds loads — never goes back to HBM.
                s = scratch_refs[i]
                m = batch * l_out
                zero_row = jnp.zeros((1, c_out), jnp.float32)
                s[pl.ds(0, 1), :] = zero_row
                s[pl.ds(m + 1, 1), :] = zero_row
                s[pl.ds(1, m), :] = act
                in_ref = s

        # final Conv1d(c_last, 1, kernel=l_last, stride 1, pad 0, bias=False) + Sigmoid,
        # fused: elementwise product with the per-row expanded weight, then a tiny
        # [batch, M_last] 0/1 selector dot sums each batch's rows.
        prod = act * wf_ref[...]                                        # [M_last, c_last]
        per_b = jnp.dot(gsel_ref[...], prod,
                        preferred_element_type=jnp.float32)             # [batch, c_last]
        o_ref[...] = jax.nn.sigmoid(jnp.sum(per_b, axis=1, keepdims=True))

    return kernel


# ------------------------------- glue (JAX) --------------------------------- #

def _w_tapmajor(w):
    """PyTorch Conv1d weight [C_out, C_in, k] -> [k*C_in, C_out] bf16, tap-major rows
    to match the in-kernel tap-concatenated patches."""
    c_out, c_in, k = w.shape
    return jnp.transpose(w, (2, 1, 0)).reshape(k * c_in, c_out).astype(jnp.bfloat16)


def discriminator_forward(x_ncl, block_params, w_final):
    batch, c0, l0 = x_ncl.shape
    channels = [p["w1"].shape[0] for p in block_params]
    n_blocks = len(channels)
    lengths = []
    l = l0
    for _ in channels:
        l //= 2
        lengths.append(l)
    l_last, c_last = lengths[-1], channels[-1]
    m_last = batch * l_last

    # channels-last flat rows (batch, length); one zero row of padding at each end
    # so the kernel's stride-2 tap reads stay in bounds.
    x_flat = jnp.transpose(x_ncl, (0, 2, 1)).reshape(batch * l0, c0).astype(jnp.float32)
    xp = jnp.pad(x_flat, ((1, 1), (0, 0)))

    operands = [xp]
    for p in block_params:
        w1cat = jnp.concatenate([_w_tapmajor(p["w1"]), _w_tapmajor(p["wsc"])], axis=1)
        w2cat = _w_tapmajor(p["w2"])
        bn_a = jnp.stack([jnp.concatenate([p["g1"], p["gsc"]]),
                          jnp.concatenate([p["b1"], p["bsc"]])]).astype(jnp.float32)
        bn_b = jnp.stack([p["g2"], p["b2"]]).astype(jnp.float32)
        operands += [w1cat, w2cat, bn_a, bn_b]

    # final conv weight expanded per output row + 0/1 batch-segment selector
    wf_exp = jnp.tile(jnp.transpose(w_final[0], (1, 0)), (batch, 1)).astype(jnp.float32)
    gsel = (jnp.arange(m_last)[None, :] // l_last
            == jnp.arange(batch)[:, None]).astype(jnp.float32)
    operands += [wf_exp, gsel]

    scratch = [pltpu.VMEM((batch * lengths[i] + 2, channels[i]), jnp.float32)
               for i in range(n_blocks - 1)]

    out = pl.pallas_call(
        _make_disc_kernel(batch, l0, channels),
        out_shape=jax.ShapeDtypeStruct((batch, 1), jnp.float32),
        in_specs=[_VMEM] * len(operands),
        out_specs=_VMEM,
        scratch_shapes=scratch,
    )(*operands)
    # TODO(synk): for large batch*length, tile the row axis with a ("parallel",) grid
    # (v7x megacore / 64 MiB VMEM budget), turn _bn into a cross-tile sum/sumsq
    # reduction + normalize pass, and size pltpu.CompilerParams(vmem_limit_bytes=...).
    return out.reshape(batch, 1, 1)


def init_discriminator_params(key, input_channels, input_size, neurons):
    params = []
    prev = input_channels
    keys = jax.random.split(key, 3 * len(neurons) + 1)
    ki = 0
    for n in neurons:
        # identity-shortcut case (in==out) is shape-inconsistent in the PyTorch
        # module itself (length mismatch in the residual add), so require in != out.
        assert prev != n, "ResidualBlock identity shortcut is ill-posed (length mismatch)"
        w1 = 0.1 * jax.random.normal(keys[ki], (n, prev, 4), jnp.float32); ki += 1
        w2 = 0.1 * jax.random.normal(keys[ki], (n, n, 4), jnp.float32); ki += 1
        wsc = 0.1 * jax.random.normal(keys[ki], (n, prev, 4), jnp.float32); ki += 1
        params.append(dict(
            w1=w1, g1=jnp.ones((n,)), b1=jnp.zeros((n,)),   # BN defaults: gamma=1, beta=0
            w2=w2, g2=jnp.ones((n,)), b2=jnp.zeros((n,)),
            wsc=wsc, gsc=jnp.ones((n,)), bsc=jnp.zeros((n,)),
        ))
        prev = n
    kf = input_size // (2 ** len(neurons))
    w_final = 0.1 * jax.random.normal(keys[ki], (1, prev, kf), jnp.float32)
    return params, w_final


# -------------------------- pure-JAX f32 reference -------------------------- #

def _conv1d_ref(x, w, stride, pad):
    return jax.lax.conv_general_dilated(
        x, w, window_strides=(stride,), padding=[(pad, pad)],
        dimension_numbers=("NCH", "OIH", "NCH"))


def _bn_ref(y, g, b):
    mean = jnp.mean(y, axis=(0, 2), keepdims=True)
    var = jnp.mean(jnp.square(y - mean), axis=(0, 2), keepdims=True)
    return (y - mean) * jax.lax.rsqrt(var + _EPS) * g[None, :, None] + b[None, :, None]


def discriminator_reference(x, block_params, w_final):
    h = x
    for p in block_params:
        r = _leaky(_bn_ref(_conv1d_ref(h, p["w1"], 2, 1), p["g1"], p["b1"]))
        r = jnp.pad(r, ((0, 0), (0, 0), (0, 1)))
        r = _bn_ref(_conv1d_ref(r, p["w2"], 1, 1), p["g2"], p["b2"])
        s = _bn_ref(_conv1d_ref(h, p["wsc"], 2, 1), p["gsc"], p["bsc"])
        h = _leaky(r + s)
    return jax.nn.sigmoid(_conv1d_ref(h, w_final, 1, 0))


if __name__ == "__main__":
    key = jax.random.PRNGKey(0)
    input_channels, input_size, neurons = 4, 16, [8, 16]
    batch = 2

    kx, kp = jax.random.split(key)
    x = jax.random.normal(kx, (batch, input_channels, input_size), jnp.float32)
    block_params, w_final = init_discriminator_params(
        kp, input_channels, input_size, neurons)

    fwd = jax.jit(lambda xx: discriminator_forward(xx, block_params, w_final))
    out = fwd(x)
    jax.block_until_ready(out)

    assert out.shape == (batch, 1, 1), out.shape
    assert bool(jnp.all((out >= 0.0) & (out <= 1.0)))

    # tolerance check vs pure-JAX f32 reference (kernel uses bf16 MXU operands)
    ref = discriminator_reference(x, block_params, w_final)
    assert jnp.allclose(out, ref, atol=5e-2), (out.ravel(), ref.ravel())

    print("KERNEL_OK")
</pallas_src>

<mosaic_0001>
module attributes {stable_mosaic.version = 11 : i64} {
  func.func @kernel(%arg0: memref<34x4xf32, #tpu.memory_space<vmem>>, %arg1: memref<16x16xbf16, #tpu.memory_space<vmem>>, %arg2: memref<32x8xbf16, #tpu.memory_space<vmem>>, %arg3: memref<2x16xf32, #tpu.memory_space<vmem>>, %arg4: memref<2x8xf32, #tpu.memory_space<vmem>>, %arg5: memref<32x32xbf16, #tpu.memory_space<vmem>>, %arg6: memref<64x16xbf16, #tpu.memory_space<vmem>>, %arg7: memref<2x32xf32, #tpu.memory_space<vmem>>, %arg8: memref<2x16xf32, #tpu.memory_space<vmem>>, %arg9: memref<8x16xf32, #tpu.memory_space<vmem>>, %arg10: memref<2x8xf32, #tpu.memory_space<vmem>>, %arg11: memref<2x1xf32, #tpu.memory_space<vmem>>, %arg12: memref<18x8xf32, #tpu.memory_space<vmem>>) attributes {dimension_semantics = [], scalar_prefetch = 0 : i64, scratch_operands = 1 : i64, tpu.core_type = #tpu.core_type<tc>} {
    %c0 = arith.constant 0 : index
    %c0_0 = arith.constant 0 : index
    %0 = vector.load %arg1[%c0, %c0_0] : memref<16x16xbf16, #tpu.memory_space<vmem>>, vector<16x16xbf16>
    %c0_1 = arith.constant 0 : index
    %c0_2 = arith.constant 0 : index
    %1 = vector.load %arg2[%c0_1, %c0_2] : memref<32x8xbf16, #tpu.memory_space<vmem>>, vector<32x8xbf16>
    %c0_3 = arith.constant 0 : index
    %c0_4 = arith.constant 0 : index
    %2 = vector.load %arg3[%c0_3, %c0_4] : memref<2x16xf32, #tpu.memory_space<vmem>>, vector<2x16xf32>
    %c0_5 = arith.constant 0 : index
    %c0_6 = arith.constant 0 : index
    %3 = vector.load %arg4[%c0_5, %c0_6] : memref<2x8xf32, #tpu.memory_space<vmem>>, vector<2x8xf32>
    %4 = tpu.iota {dimensions = array<i32: 0>} : vector<16x1xi32>
    %c8_i32 = arith.constant 8 : i32
    %c0_i32 = arith.constant 0 : i32
    %5 = arith.cmpi eq, %c8_i32, %c0_i32 : i32
    %c1_i32 = arith.constant 1 : i32
    %6 = arith.select %5, %c1_i32, %c8_i32 : i32
    %7 = vector.broadcast %6 : i32 to vector<16x1xi32>
    %8 = arith.remsi %4, %7 : vector<16x1xi32>
    %c0_i32_7 = arith.constant 0 : i32
    %9 = vector.broadcast %c0_i32_7 : i32 to vector<16x1xi32>
    %10 = arith.cmpi ne, %8, %9 : vector<16x1xi32>
    %c0_i32_8 = arith.constant 0 : i32
    %11 = vector.broadcast %c0_i32_8 : i32 to vector<16x1xi32>
    %12 = arith.cmpi slt, %8, %11 : vector<16x1xi32>
    %c0_i32_9 = arith.constant 0 : i32
    %13 = arith.cmpi slt, %6, %c0_i32_9 : i32
    %14 = vector.broadcast %13 : i1 to vector<16x1xi1>
    %15 = vector.broadcast %14 : vector<16x1xi1> to vector<16x1xi1>
    %16 = arith.xori %12, %15 : vector<16x1xi1>
    %17 = arith.andi %16, %10 : vector<16x1xi1>
    %18 = vector.broadcast %6 : i32 to vector<16x1xi32>
    %19 = arith.addi %8, %18 : vector<16x1xi32>
    %20 = arith.select %17, %19, %8 : vector<16x1xi1>, vector<16x1xi32>
    %c0_10 = arith.constant 0 : index
    %c0_11 = arith.constant 0 : index
    %21 = tpu.strided_load %arg0[%c0_10, %c0_11] {strides = array<i32: 2, 1>} : memref<34x4xf32, #tpu.memory_space<vmem>>, vector<16x4xf32>
    %c0_i32_12 = arith.constant 0 : i32
    %22 = vector.broadcast %c0_i32_12 : i32 to vector<16x1xi32>
    %23 = arith.cmpi eq, %20, %22 : vector<16x1xi32>
    %cst = arith.constant 0.000000e+00 : f32
    %24 = vector.broadcast %cst : f32 to vector<16x4xf32>
    %25 = vector.shape_cast %23 : vector<16x1xi1> to vector<16x1xi1>
    %26 = vector.broadcast %25 : vector<16x1xi1> to vector<16x4xi1>
    %27 = arith.select %26, %24, %21 : vector<16x4xi1>, vector<16x4xf32>
    %c1 = arith.constant 1 : index
    %c0_13 = arith.constant 0 : index
    %28 = tpu.strided_load %arg0[%c1, %c0_13] {strides = array<i32: 2, 1>} : memref<34x4xf32, #tpu.memory_space<vmem>>, vector<16x4xf32>
    %c2 = arith.constant 2 : index
    %c0_14 = arith.constant 0 : index
    %29 = tpu.strided_load %arg0[%c2, %c0_14] {strides = array<i32: 2, 1>} : memref<34x4xf32, #tpu.memory_space<vmem>>, vector<16x4xf32>
    %c3 = arith.constant 3 : index
    %c0_15 = arith.constant 0 : index
    %30 = tpu.strided_load %arg0[%c3, %c0_15] {strides = array<i32: 2, 1>} : memref<34x4xf32, #tpu.memory_space<vmem>>, vector<16x4xf32>
    %c7_i32 = arith.constant 7 : i32
    %31 = vector.broadcast %c7_i32 : i32 to vector<16x1xi32>
    %32 = arith.cmpi eq, %20, %31 : vector<16x1xi32>
    %cst_16 = arith.constant 0.000000e+00 : f32
    %33 = vector.broadcast %cst_16 : f32 to vector<16x4xf32>
    %34 = vector.shape_cast %32 : vector<16x1xi1> to vector<16x1xi1>
    %35 = vector.broadcast %34 : vector<16x1xi1> to vector<16x4xi1>
    %36 = arith.select %35, %33, %30 : vector<16x4xi1>, vector<16x4xf32>
    %37 = tpu.concatenate %27, %28, %29, %36 in 1 : vector<16x4xf32>, vector<16x4xf32>, vector<16x4xf32>, vector<16x4xf32> -> vector<16x16xf32>
    %38 = arith.truncf %37 : vector<16x16xf32> to vector<16x16xbf16>
    %cst_17 = arith.constant dense<0.000000e+00> : vector<16x16xf32>
    %39 = tpu.matmul %38, %0, %cst_17 {dimension_numbers = #tpu.dot_dimension_numbers<[1], [0], [0], [1], [0, 0, 1, 1], [], []>} : vector<16x16xbf16>, vector<16x16xbf16>, vector<16x16xf32> -> vector<16x16xf32>
    %40 = vector.extract_strided_slice %2 {offsets = [0, 0], sizes = [1, 16], strides = [1, 1]} : vector<2x16xf32> to vector<1x16xf32>
    %41 = vector.extract_strided_slice %2 {offsets = [1, 0], sizes = [1, 16], strides = [1, 1]} : vector<2x16xf32> to vector<1x16xf32>
    %cst_18 = arith.constant dense<0.000000e+00> : vector<16xf32>
    %42 = vector.multi_reduction <add>, %39, %cst_18 [0] : vector<16x16xf32> to vector<16xf32>
    %43 = vector.shape_cast %42 : vector<16xf32> to vector<1x16xf32>
    %cst_19 = arith.constant 6.250000e-02 : f32
    %44 = vector.broadcast %cst_19 : f32 to vector<1x16xf32>
    %45 = arith.mulf %43, %44 : vector<1x16xf32>
    %46 = arith.mulf %39, %39 : vector<16x16xf32>
    %cst_20 = arith.constant dense<0.000000e+00> : vector<16xf32>
    %47 = vector.multi_reduction <add>, %46, %cst_20 [0] : vector<16x16xf32> to vector<16xf32>
    %48 = vector.shape_cast %47 : vector<16xf32> to vector<1x16xf32>
    %cst_21 = arith.constant 6.250000e-02 : f32
    %49 = vector.broadcast %cst_21 : f32 to vector<1x16xf32>
    %50 = arith.mulf %48, %49 : vector<1x16xf32>
    %51 = arith.mulf %45, %45 : vector<1x16xf32>
    %52 = arith.subf %50, %51 : vector<1x16xf32>
    %53 = vector.broadcast %45 : vector<1x16xf32> to vector<16x16xf32>
    %54 = arith.subf %39, %53 : vector<16x16xf32>
    %cst_22 = arith.constant 9.99999974E-6 : f32
    %55 = vector.broadcast %cst_22 : f32 to vector<1x16xf32>
    %56 = arith.addf %52, %55 : vector<1x16xf32>
    %57 = math.rsqrt %56 : vector<1x16xf32>
    %58 = vector.broadcast %57 : vector<1x16xf32> to vector<16x16xf32>
    %59 = arith.mulf %54, %58 : vector<16x16xf32>
    %60 = vector.broadcast %40 : vector<1x16xf32> to vector<16x16xf32>
    %61 = arith.mulf %59, %60 : vector<16x16xf32>
    %62 = vector.broadcast %41 : vector<1x16xf32> to vector<16x16xf32>
    %63 = arith.addf %61, %62 : vector<16x16xf32>
    %64 = vector.extract_strided_slice %63 {offsets = [0, 0], sizes = [16, 8], strides = [1, 1]} : vector<16x16xf32> to vector<16x8xf32>
    %cst_23 = arith.constant 0.000000e+00 : f32
    %65 = vector.broadcast %cst_23 : f32 to vector<16x8xf32>
    %66 = arith.cmpf oge, %64, %65 : vector<16x8xf32>
    %cst_24 = arith.constant 2.000000e-01 : f32
    %67 = vector.broadcast %cst_24 : f32 to vector<16x8xf32>
    %68 = arith.mulf %67, %64 : vector<16x8xf32>
    %69 = arith.select %66, %64, %68 : vector<16x8xi1>, vector<16x8xf32>
    %70 = vector.extract_strided_slice %63 {offsets = [0, 8], sizes = [16, 8], strides = [1, 1]} : vector<16x16xf32> to vector<16x8xf32>
    %c1_i32_25 = arith.constant 1 : i32
    %71 = tpu.dynamic_rotate %69 by %c1_i32_25 dim 0 : vector<16x8xf32>, i32 -> vector<16x8xf32>
    %c-1_i32 = arith.constant -1 : i32
    %72 = vector.broadcast %c-1_i32 : i32 to vector<16x1xi32>
    %73 = arith.addi %20, %72 : vector<16x1xi32>
    %c0_i32_26 = arith.constant 0 : i32
    %74 = vector.broadcast %c0_i32_26 : i32 to vector<16x1xi32>
    %75 = arith.cmpi sge, %73, %74 : vector<16x1xi32>
    %c-1_i32_27 = arith.constant -1 : i32
    %76 = vector.broadcast %c-1_i32_27 : i32 to vector<16x1xi32>
    %77 = arith.addi %20, %76 : vector<16x1xi32>
    %c8_i32_28 = arith.constant 8 : i32
    %78 = vector.broadcast %c8_i32_28 : i32 to vector<16x1xi32>
    %79 = arith.cmpi slt, %77, %78 : vector<16x1xi32>
    %80 = arith.andi %75, %79 : vector<16x1xi1>
    %cst_29 = arith.constant 0.000000e+00 : f32
    %81 = vector.broadcast %cst_29 : f32 to vector<16x8xf32>
    %82 = vector.shape_cast %80 : vector<16x1xi1> to vector<16x1xi1>
    %83 = vector.broadcast %82 : vector<16x1xi1> to vector<16x8xi1>
    %84 = arith.select %83, %71, %81 : vector<16x8xi1>, vector<16x8xf32>
    %c15_i32 = arith.constant 15 : i32
    %85 = tpu.dynamic_rotate %69 by %c15_i32 dim 0 : vector<16x8xf32>, i32 -> vector<16x8xf32>
    %c1_i32_30 = arith.constant 1 : i32
    %86 = vector.broadcast %c1_i32_30 : i32 to vector<16x1xi32>
    %87 = arith.addi %20, %86 : vector<16x1xi32>
    %c0_i32_31 = arith.constant 0 : i32
    %88 = vector.broadcast %c0_i32_31 : i32 to vector<16x1xi32>
    %89 = arith.cmpi sge, %87, %88 : vector<16x1xi32>
    %c1_i32_32 = arith.constant 1 : i32
    %90 = vector.broadcast %c1_i32_32 : i32 to vector<16x1xi32>
    %91 = arith.addi %20, %90 : vector<16x1xi32>
    %c8_i32_33 = arith.constant 8 : i32
    %92 = vector.broadcast %c8_i32_33 : i32 to vector<16x1xi32>
    %93 = arith.cmpi slt, %91, %92 : vector<16x1xi32>
    %94 = arith.andi %89, %93 : vector<16x1xi1>
    %cst_34 = arith.constant 0.000000e+00 : f32
    %95 = vector.broadcast %cst_34 : f32 to vector<16x8xf32>
    %96 = vector.shape_cast %94 : vector<16x1xi1> to vector<16x1xi1>
    %97 = vector.broadcast %96 : vector<16x1xi1> to vector<16x8xi1>
    %98 = arith.select %97, %85, %95 : vector<16x8xi1>, vector<16x8xf32>
    %c14_i32 = arith.constant 14 : i32
    %99 = tpu.dynamic_rotate %69 by %c14_i32 dim 0 : vector<16x8xf32>, i32 -> vector<16x8xf32>
    %c2_i32 = arith.constant 2 : i32
    %100 = vector.broadcast %c2_i32 : i32 to vector<16x1xi32>
    %101 = arith.addi %20, %100 : vector<16x1xi32>
    %c0_i32_35 = arith.constant 0 : i32
    %102 = vector.broadcast %c0_i32_35 : i32 to vector<16x1xi32>
    %103 = arith.cmpi sge, %101, %102 : vector<16x1xi32>
    %c2_i32_36 = arith.constant 2 : i32
    %104 = vector.broadcast %c2_i32_36 : i32 to vector<16x1xi32>
    %105 = arith.addi %20, %104 : vector<16x1xi32>
    %c8_i32_37 = arith.constant 8 : i32
    %106 = vector.broadcast %c8_i32_37 : i32 to vector<16x1xi32>
    %107 = arith.cmpi slt, %105, %106 : vector<16x1xi32>
    %108 = arith.andi %103, %107 : vector<16x1xi1>
    %cst_38 = arith.constant 0.000000e+00 : f32
    %109 = vector.broadcast %cst_38 : f32 to vector<16x8xf32>
    %110 = vector.shape_cast %108 : vector<16x1xi1> to vector<16x1xi1>
    %111 = vector.broadcast %110 : vector<16x1xi1> to vector<16x8xi1>
    %112 = arith.select %111, %99, %109 : vector<16x8xi1>, vector<16x8xf32>
    %113 = tpu.concatenate %84, %69, %98, %112 in 1 : vector<16x8xf32>, vector<16x8xf32>, vector<16x8xf32>, vector<16x8xf32> -> vector<16x32xf32>
    %114 = arith.truncf %113 : vector<16x32xf32> to vector<16x32xbf16>
    %cst_39 = arith.constant dense<0.000000e+00> : vector<16x8xf32>
    %115 = tpu.matmul %114, %1, %cst_39 {dimension_numbers = #tpu.dot_dimension_numbers<[1], [0], [0], [1], [0, 0, 1, 1], [], []>} : vector<16x32xbf16>, vector<32x8xbf16>, vector<16x8xf32> -> vector<16x8xf32>
    %116 = vector.extract_strided_slice %3 {offsets = [0, 0], sizes = [1, 8], strides = [1, 1]} : vector<2x8xf32> to vector<1x8xf32>
    %117 = vector.extract_strided_slice %3 {offsets = [1, 0], sizes = [1, 8], strides = [1, 1]} : vector<2x8xf32> to vector<1x8xf32>
    %cst_40 = arith.constant dense<0.000000e+00> : vector<8xf32>
    %118 = vector.multi_reduction <add>, %115, %cst_40 [0] : vector<16x8xf32> to vector<8xf32>
    %119 = vector.shape_cast %118 : vector<8xf32> to vector<1x8xf32>
    %cst_41 = arith.constant 6.250000e-02 : f32
    %120 = vector.broadcast %cst_41 : f32 to vector<1x8xf32>
    %121 = arith.mulf %119, %120 : vector<1x8xf32>
    %122 = arith.mulf %115, %115 : vector<16x8xf32>
    %cst_42 = arith.constant dense<0.000000e+00> : vector<8xf32>
    %123 = vector.multi_reduction <add>, %122, %cst_42 [0] : vector<16x8xf32> to vector<8xf32>
    %124 = vector.shape_cast %123 : vector<8xf32> to vector<1x8xf32>
    %cst_43 = arith.constant 6.250000e-02 : f32
    %125 = vector.broadcast %cst_43 : f32 to vector<1x8xf32>
    %126 = arith.mulf %124, %125 : vector<1x8xf32>
    %127 = arith.mulf %121, %121 : vector<1x8xf32>
    %128 = arith.subf %126, %127 : vector<1x8xf32>
    %129 = vector.broadcast %121 : vector<1x8xf32> to vector<16x8xf32>
    %130 = arith.subf %115, %129 : vector<16x8xf32>
    %cst_44 = arith.constant 9.99999974E-6 : f32
    %131 = vector.broadcast %cst_44 : f32 to vector<1x8xf32>
    %132 = arith.addf %128, %131 : vector<1x8xf32>
    %133 = math.rsqrt %132 : vector<1x8xf32>
    %134 = vector.broadcast %133 : vector<1x8xf32> to vector<16x8xf32>
    %135 = arith.mulf %130, %134 : vector<16x8xf32>
    %136 = vector.broadcast %116 : vector<1x8xf32> to vector<16x8xf32>
    %137 = arith.mulf %135, %136 : vector<16x8xf32>
    %138 = vector.broadcast %117 : vector<1x8xf32> to vector<16x8xf32>
    %139 = arith.addf %137, %138 : vector<16x8xf32>
    %140 = arith.addf %139, %70 : vector<16x8xf32>
    %cst_45 = arith.constant 0.000000e+00 : f32
    %141 = vector.broadcast %cst_45 : f32 to vector<16x8xf32>
    %142 = arith.cmpf oge, %140, %141 : vector<16x8xf32>
    %cst_46 = arith.constant 2.000000e-01 : f32
    %143 = vector.broadcast %cst_46 : f32 to vector<16x8xf32>
    %144 = arith.mulf %143, %140 : vector<16x8xf32>
    %145 = arith.select %142, %140, %144 : vector<16x8xi1>, vector<16x8xf32>
    %cst_47 = arith.constant 0.000000e+00 : f32
    %146 = vector.broadcast %cst_47 : f32 to vector<1x8xf32>
    %c0_48 = arith.constant 0 : index
    %c0_49 = arith.constant 0 : index
    %147 = vector.load %arg12[%c0_48, %c0_49] : memref<18x8xf32, #tpu.memory_space<vmem>>, vector<1x8xf32>
    tpu.vector_store %arg12[%c0_48, %c0_49], %146 {strides = array<i32>} : memref<18x8xf32, #tpu.memory_space<vmem>>, vector<1x8xf32>,
    %c17 = arith.constant 17 : index
    %c0_50 = arith.constant 0 : index
    %148 = vector.load %arg12[%c17, %c0_50] : memref<18x8xf32, #tpu.memory_space<vmem>>, vector<1x8xf32>
    tpu.vector_store %arg12[%c17, %c0_50], %146 {strides = array<i32>} : memref<18x8xf32, #tpu.memory_space<vmem>>, vector<1x8xf32>,
    %c1_51 = arith.constant 1 : index
    %c0_52 = arith.constant 0 : index
    %149 = vector.load %arg12[%c1_51, %c0_52] : memref<18x8xf32, #tpu.memory_space<vmem>>, vector<16x8xf32>
    tpu.vector_store %arg12[%c1_51, %c0_52], %145 {strides = array<i32>} : memref<18x8xf32, #tpu.memory_space<vmem>>, vector<16x8xf32>,
    %c0_53 = arith.constant 0 : index
    %c0_54 = arith.constant 0 : index
    %150 = vector.load %arg5[%c0_53, %c0_54] : memref<32x32xbf16, #tpu.memory_space<vmem>>, vector<32x32xbf16>
    %c0_55 = arith.constant 0 : index
    %c0_56 = arith.constant 0 : index
    %151 = vector.load %arg6[%c0_55, %c0_56] : memref<64x16xbf16, #tpu.memory_space<vmem>>, vector<64x16xbf16>
    %c0_57 = arith.constant 0 : index
    %c0_58 = arith.constant 0 : index
    %152 = vector.load %arg7[%c0_57, %c0_58] : memref<2x32xf32, #tpu.memory_space<vmem>>, vector<2x32xf32>
    %c0_59 = arith.constant 0 : index
    %c0_60 = arith.constant 0 : index
    %153 = vector.load %arg8[%c0_59, %c0_60] : memref<2x16xf32, #tpu.memory_space<vmem>>, vector<2x16xf32>
    %154 = tpu.iota {dimensions = array<i32: 0>} : vector<8x1xi32>
    %c4_i32 = arith.constant 4 : i32
    %c0_i32_61 = arith.constant 0 : i32
    %155 = arith.cmpi eq, %c4_i32, %c0_i32_61 : i32
    %c1_i32_62 = arith.constant 1 : i32
    %156 = arith.select %155, %c1_i32_62, %c4_i32 : i32
    %157 = vector.broadcast %156 : i32 to vector<8x1xi32>
    %158 = arith.remsi %154, %157 : vector<8x1xi32>
    %c0_i32_63 = arith.constant 0 : i32
    %159 = vector.broadcast %c0_i32_63 : i32 to vector<8x1xi32>
    %160 = arith.cmpi ne, %158, %159 : vector<8x1xi32>
    %c0_i32_64 = arith.constant 0 : i32
    %161 = vector.broadcast %c0_i32_64 : i32 to vector<8x1xi32>
    %162 = arith.cmpi slt, %158, %161 : vector<8x1xi32>
    %c0_i32_65 = arith.constant 0 : i32
    %163 = arith.cmpi slt, %156, %c0_i32_65 : i32
    %164 = vector.broadcast %163 : i1 to vector<8x1xi1>
    %165 = vector.broadcast %164 : vector<8x1xi1> to vector<8x1xi1>
    %166 = arith.xori %162, %165 : vector<8x1xi1>
    %167 = arith.andi %166, %160 : vector<8x1xi1>
    %168 = vector.broadcast %156 : i32 to vector<8x1xi32>
    %169 = arith.addi %158, %168 : vector<8x1xi32>
    %170 = arith.select %167, %169, %158 : vector<8x1xi1>, vector<8x1xi32>
    %c0_66 = arith.constant 0 : index
    %c0_67 = arith.constant 0 : index
    %171 = tpu.strided_load %arg12[%c0_66, %c0_67] {strides = array<i32: 2, 1>} : memref<18x8xf32, #tpu.memory_space<vmem>>, vector<8x8xf32>
    %c0_i32_68 = arith.constant 0 : i32
    %172 = vector.broadcast %c0_i32_68 : i32 to vector<8x1xi32>
    %173 = arith.cmpi eq, %170, %172 : vector<8x1xi32>
    %cst_69 = arith.constant 0.000000e+00 : f32
    %174 = vector.broadcast %cst_69 : f32 to vector<8x8xf32>
    %175 = vector.shape_cast %173 : vector<8x1xi1> to vector<8x1xi1>
    %176 = vector.broadcast %175 : vector<8x1xi1> to vector<8x8xi1>
    %177 = arith.select %176, %174, %171 : vector<8x8xi1>, vector<8x8xf32>
    %c1_70 = arith.constant 1 : index
    %c0_71 = arith.constant 0 : index
    %178 = tpu.strided_load %arg12[%c1_70, %c0_71] {strides = array<i32: 2, 1>} : memref<18x8xf32, #tpu.memory_space<vmem>>, vector<8x8xf32>
    %c2_72 = arith.constant 2 : index
    %c0_73 = arith.constant 0 : index
    %179 = tpu.strided_load %arg12[%c2_72, %c0_73] {strides = array<i32: 2, 1>} : memref<18x8xf32, #tpu.memory_space<vmem>>, vector<8x8xf32>
    %c3_74 = arith.constant 3 : index
    %c0_75 = arith.constant 0 : index
    %180 = tpu.strided_load %arg12[%c3_74, %c0_75] {strides = array<i32: 2, 1>} : memref<18x8xf32, #tpu.memory_space<vmem>>, vector<8x8xf32>
    %c3_i32 = arith.constant 3 : i32
    %181 = vector.broadcast %c3_i32 : i32 to vector<8x1xi32>
    %182 = arith.cmpi eq, %170, %181 : vector<8x1xi32>
    %cst_76 = arith.constant 0.000000e+00 : f32
    %183 = vector.broadcast %cst_76 : f32 to vector<8x8xf32>
    %184 = vector.shape_cast %182 : vector<8x1xi1> to vector<8x1xi1>
    %185 = vector.broadcast %184 : vector<8x1xi1> to vector<8x8xi1>
    %186 = arith.select %185, %183, %180 : vector<8x8xi1>, vector<8x8xf32>
    %187 = tpu.concatenate %177, %178, %179, %186 in 1 : vector<8x8xf32>, vector<8x8xf32>, vector<8x8xf32>, vector<8x8xf32> -> vector<8x32xf32>
    %188 = arith.truncf %187 : vector<8x32xf32> to vector<8x32xbf16>
    %cst_77 = arith.constant dense<0.000000e+00> : vector<8x32xf32>
    %189 = tpu.matmul %188, %150, %cst_77 {dimension_numbers = #tpu.dot_dimension_numbers<[1], [0], [0], [1], [0, 0, 1, 1], [], []>} : vector<8x32xbf16>, vector<32x32xbf16>, vector<8x32xf32> -> vector<8x32xf32>
    %190 = vector.extract_strided_slice %152 {offsets = [0, 0], sizes = [1, 32], strides = [1, 1]} : vector<2x32xf32> to vector<1x32xf32>
    %191 = vector.extract_strided_slice %152 {offsets = [1, 0], sizes = [1, 32], strides = [1, 1]} : vector<2x32xf32> to vector<1x32xf32>
    %cst_78 = arith.constant dense<0.000000e+00> : vector<32xf32>
    %192 = vector.multi_reduction <add>, %189, %cst_78 [0] : vector<8x32xf32> to vector<32xf32>
    %193 = vector.shape_cast %192 : vector<32xf32> to vector<1x32xf32>
    %cst_79 = arith.constant 1.250000e-01 : f32
    %194 = vector.broadcast %cst_79 : f32 to vector<1x32xf32>
    %195 = arith.mulf %193, %194 : vector<1x32xf32>
    %196 = arith.mulf %189, %189 : vector<8x32xf32>
    %cst_80 = arith.constant dense<0.000000e+00> : vector<32xf32>
    %197 = vector.multi_reduction <add>, %196, %cst_80 [0] : vector<8x32xf32> to vector<32xf32>
    %198 = vector.shape_cast %197 : vector<32xf32> to vector<1x32xf32>
    %cst_81 = arith.constant 1.250000e-01 : f32
    %199 = vector.broadcast %cst_81 : f32 to vector<1x32xf32>
    %200 = arith.mulf %198, %199 : vector<1x32xf32>
    %201 = arith.mulf %195, %195 : vector<1x32xf32>
    %202 = arith.subf %200, %201 : vector<1x32xf32>
    %203 = vector.broadcast %195 : vector<1x32xf32> to vector<8x32xf32>
    %204 = arith.subf %189, %203 : vector<8x32xf32>
    %cst_82 = arith.constant 9.99999974E-6 : f32
    %205 = vector.broadcast %cst_82 : f32 to vector<1x32xf32>
    %206 = arith.addf %202, %205 : vector<1x32xf32>
    %207 = math.rsqrt %206 : vector<1x32xf32>
    %208 = vector.broadcast %207 : vector<1x32xf32> to vector<8x32xf32>
    %209 = arith.mulf %204, %208 : vector<8x32xf32>
    %210 = vector.broadcast %190 : vector<1x32xf32> to vector<8x32xf32>
    %211 = arith.mulf %209, %210 : vector<8x32xf32>
    %212 = vector.broadcast %191 : vector<1x32xf32> to vector<8x32xf32>
    %213 = arith.addf %211, %212 : vector<8x32xf32>
    %214 = vector.extract_strided_slice %213 {offsets = [0, 0], sizes = [8, 16], strides = [1, 1]} : vector<8x32xf32> to vector<8x16xf32>
    %cst_83 = arith.constant 0.000000e+00 : f32
    %215 = vector.broadcast %cst_83 : f32 to vector<8x16xf32>
    %216 = arith.cmpf oge, %214, %215 : vector<8x16xf32>
    %cst_84 = arith.constant 2.000000e-01 : f32
    %217 = vector.broadcast %cst_84 : f32 to vector<8x16xf32>
    %218 = arith.mulf %217, %214 : vector<8x16xf32>
    %219 = arith.select %216, %214, %218 : vector<8x16xi1>, vector<8x16xf32>
    %220 = vector.extract_strided_slice %213 {offsets = [0, 16], sizes = [8, 16], strides = [1, 1]} : vector<8x32xf32> to vector<8x16xf32>
    %c1_i32_85 = arith.constant 1 : i32
    %221 = tpu.dynamic_rotate %219 by %c1_i32_85 dim 0 : vector<8x16xf32>, i32 -> vector<8x16xf32>
    %c-1_i32_86 = arith.constant -1 : i32
    %222 = vector.broadcast %c-1_i32_86 : i32 to vector<8x1xi32>
    %223 = arith.addi %170, %222 : vector<8x1xi32>
    %c0_i32_87 = arith.constant 0 : i32
    %224 = vector.broadcast %c0_i32_87 : i32 to vector<8x1xi32>
    %225 = arith.cmpi sge, %223, %224 : vector<8x1xi32>
    %c-1_i32_88 = arith.constant -1 : i32
    %226 = vector.broadcast %c-1_i32_88 : i32 to vector<8x1xi32>
    %227 = arith.addi %170, %226 : vector<8x1xi32>
    %c4_i32_89 = arith.constant 4 : i32
    %228 = vector.broadcast %c4_i32_89 : i32 to vector<8x1xi32>
    %229 = arith.cmpi slt, %227, %228 : vector<8x1xi32>
    %230 = arith.andi %225, %229 : vector<8x1xi1>
    %cst_90 = arith.constant 0.000000e+00 : f32
    %231 = vector.broadcast %cst_90 : f32 to vector<8x16xf32>
    %232 = vector.shape_cast %230 : vector<8x1xi1> to vector<8x1xi1>
    %233 = vector.broadcast %232 : vector<8x1xi1> to vector<8x16xi1>
    %234 = arith.select %233, %221, %231 : vector<8x16xi1>, vector<8x16xf32>
    %c7_i32_91 = arith.constant 7 : i32
    %235 = tpu.dynamic_rotate %219 by %c7_i32_91 dim 0 : vector<8x16xf32>, i32 -> vector<8x16xf32>
    %c1_i32_92 = arith.constant 1 : i32
    %236 = vector.broadcast %c1_i32_92 : i32 to vector<8x1xi32>
    %237 = arith.addi %170, %236 : vector<8x1xi32>
    %c0_i32_93 = arith.constant 0 : i32
    %238 = vector.broadcast %c0_i32_93 : i32 to vector<8x1xi32>
    %239 = arith.cmpi sge, %237, %238 : vector<8x1xi32>
    %c1_i32_94 = arith.constant 1 : i32
    %240 = vector.broadcast %c1_i32_94 : i32 to vector<8x1xi32>
    %241 = arith.addi %170, %240 : vector<8x1xi32>
    %c4_i32_95 = arith.constant 4 : i32
    %242 = vector.broadcast %c4_i32_95 : i32 to vector<8x1xi32>
    %243 = arith.cmpi slt, %241, %242 : vector<8x1xi32>
    %244 = arith.andi %239, %243 : vector<8x1xi1>
    %cst_96 = arith.constant 0.000000e+00 : f32
    %245 = vector.broadcast %cst_96 : f32 to vector<8x16xf32>
    %246 = vector.shape_cast %244 : vector<8x1xi1> to vector<8x1xi1>
    %247 = vector.broadcast %246 : vector<8x1xi1> to vector<8x16xi1>
    %248 = arith.select %247, %235, %245 : vector<8x16xi1>, vector<8x16xf32>
    %c6_i32 = arith.constant 6 : i32
    %249 = tpu.dynamic_rotate %219 by %c6_i32 dim 0 : vector<8x16xf32>, i32 -> vector<8x16xf32>
    %c2_i32_97 = arith.constant 2 : i32
    %250 = vector.broadcast %c2_i32_97 : i32 to vector<8x1xi32>
    %251 = arith.addi %170, %250 : vector<8x1xi32>
    %c0_i32_98 = arith.constant 0 : i32
    %252 = vector.broadcast %c0_i32_98 : i32 to vector<8x1xi32>
    %253 = arith.cmpi sge, %251, %252 : vector<8x1xi32>
    %c2_i32_99 = arith.constant 2 : i32
    %254 = vector.broadcast %c2_i32_99 : i32 to vector<8x1xi32>
    %255 = arith.addi %170, %254 : vector<8x1xi32>
    %c4_i32_100 = arith.constant 4 : i32
    %256 = vector.broadcast %c4_i32_100 : i32 to vector<8x1xi32>
    %257 = arith.cmpi slt, %255, %256 : vector<8x1xi32>
    %258 = arith.andi %253, %257 : vector<8x1xi1>
    %cst_101 = arith.constant 0.000000e+00 : f32
    %259 = vector.broadcast %cst_101 : f32 to vector<8x16xf32>
    %260 = vector.shape_cast %258 : vector<8x1xi1> to vector<8x1xi1>
    %261 = vector.broadcast %260 : vector<8x1xi1> to vector<8x16xi1>
    %262 = arith.select %261, %249, %259 : vector<8x16xi1>, vector<8x16xf32>
    %263 = tpu.concatenate %234, %219, %248, %262 in 1 : vector<8x16xf32>, vector<8x16xf32>, vector<8x16xf32>, vector<8x16xf32> -> vector<8x64xf32>
    %264 = arith.truncf %263 : vector<8x64xf32> to vector<8x64xbf16>
    %cst_102 = arith.constant dense<0.000000e+00> : vector<8x16xf32>
    %265 = tpu.matmul %264, %151, %cst_102 {dimension_numbers = #tpu.dot_dimension_numbers<[1], [0], [0], [1], [0, 0, 1, 1], [], []>} : vector<8x64xbf16>, vector<64x16xbf16>, vector<8x16xf32> -> vector<8x16xf32>
    %266 = vector.extract_strided_slice %153 {offsets = [0, 0], sizes = [1, 16], strides = [1, 1]} : vector<2x16xf32> to vector<1x16xf32>
    %267 = vector.extract_strided_slice %153 {offsets = [1, 0], sizes = [1, 16], strides = [1, 1]} : vector<2x16xf32> to vector<1x16xf32>
    %cst_103 = arith.constant dense<0.000000e+00> : vector<16xf32>
    %268 = vector.multi_reduction <add>, %265, %cst_103 [0] : vector<8x16xf32> to vector<16xf32>
    %269 = vector.shape_cast %268 : vector<16xf32> to vector<1x16xf32>
    %cst_104 = arith.constant 1.250000e-01 : f32
    %270 = vector.broadcast %cst_104 : f32 to vector<1x16xf32>
    %271 = arith.mulf %269, %270 : vector<1x16xf32>
    %272 = arith.mulf %265, %265 : vector<8x16xf32>
    %cst_105 = arith.constant dense<0.000000e+00> : vector<16xf32>
    %273 = vector.multi_reduction <add>, %272, %cst_105 [0] : vector<8x16xf32> to vector<16xf32>
    %274 = vector.shape_cast %273 : vector<16xf32> to vector<1x16xf32>
    %cst_106 = arith.constant 1.250000e-01 : f32
    %275 = vector.broadcast %cst_106 : f32 to vector<1x16xf32>
    %276 = arith.mulf %274, %275 : vector<1x16xf32>
    %277 = arith.mulf %271, %271 : vector<1x16xf32>
    %278 = arith.subf %276, %277 : vector<1x16xf32>
    %279 = vector.broadcast %271 : vector<1x16xf32> to vector<8x16xf32>
    %280 = arith.subf %265, %279 : vector<8x16xf32>
    %cst_107 = arith.constant 9.99999974E-6 : f32
    %281 = vector.broadcast %cst_107 : f32 to vector<1x16xf32>
    %282 = arith.addf %278, %281 : vector<1x16xf32>
    %283 = math.rsqrt %282 : vector<1x16xf32>
    %284 = vector.broadcast %283 : vector<1x16xf32> to vector<8x16xf32>
    %285 = arith.mulf %280, %284 : vector<8x16xf32>
    %286 = vector.broadcast %266 : vector<1x16xf32> to vector<8x16xf32>
    %287 = arith.mulf %285, %286 : vector<8x16xf32>
    %288 = vector.broadcast %267 : vector<1x16xf32> to vector<8x16xf32>
    %289 = arith.addf %287, %288 : vector<8x16xf32>
    %290 = arith.addf %289, %220 : vector<8x16xf32>
    %cst_108 = arith.constant 0.000000e+00 : f32
    %291 = vector.broadcast %cst_108 : f32 to vector<8x16xf32>
    %292 = arith.cmpf oge, %290, %291 : vector<8x16xf32>
    %cst_109 = arith.constant 2.000000e-01 : f32
    %293 = vector.broadcast %cst_109 : f32 to vector<8x16xf32>
    %294 = arith.mulf %293, %290 : vector<8x16xf32>
    %295 = arith.select %292, %290, %294 : vector<8x16xi1>, vector<8x16xf32>
    %c0_110 = arith.constant 0 : index
    %c0_111 = arith.constant 0 : index
    %296 = vector.load %arg9[%c0_110, %c0_111] : memref<8x16xf32, #tpu.memory_space<vmem>>, vector<8x16xf32>
    %297 = arith.mulf %295, %296 : vector<8x16xf32>
    %c0_112 = arith.constant 0 : index
    %c0_113 = arith.constant 0 : index
    %298 = vector.load %arg10[%c0_112, %c0_113] : memref<2x8xf32, #tpu.memory_space<vmem>>, vector<2x8xf32>
    %cst_114 = arith.constant dense<0.000000e+00> : vector<2x16xf32>
    %299 = tpu.matmul %298, %297, %cst_114 {dimension_numbers = #tpu.dot_dimension_numbers<[1], [0], [0], [1], [0, 0, 1, 1], [], []>} : vector<2x8xf32>, vector<8x16xf32>, vector<2x16xf32> -> vector<2x16xf32>
    %cst_115 = arith.constant dense<0.000000e+00> : vector<2xf32>
    %300 = vector.multi_reduction <add>, %299, %cst_115 [1] : vector<2x16xf32> to vector<2xf32>
    %301 = vector.shape_cast %300 : vector<2xf32> to vector<2x1xf32>
    %302 = arith.negf %301 : vector<2x1xf32>
    %303 = math.exp %302 : vector<2x1xf32>
    %cst_116 = arith.constant 1.000000e+00 : f32
    %304 = vector.broadcast %cst_116 : f32 to vector<2x1xf32>
    %305 = arith.addf %304, %303 : vector<2x1xf32>
    %306 = arith.divf %304, %305 : vector<2x1xf32>
    %c0_117 = arith.constant 0 : index
    %c0_118 = arith.constant 0 : index
    %307 = vector.load %arg11[%c0_117, %c0_118] : memref<2x1xf32, #tpu.memory_space<vmem>>, vector<2x1xf32>
    tpu.vector_store %arg11[%c0_117, %c0_118], %306 {strides = array<i32>} : memref<2x1xf32, #tpu.memory_space<vmem>>, vector<2x1xf32>,
    return
  }
}

</mosaic_0001>

<bundles_post_ra>
// kernel: _lambda_.1
= control target key start
LH: loop header
LB: loop body
LE: loop exit
PB: predicated region body
PF: predicated region fallthrough
CT: control target
= control target key end

     0   :  { %v47_v0 = vlaneseq  ;;  %s814_s21 = smov 4   ;;  %s815_s30 = smov 8   ;;  %vm129_vm4 = vcmask 31744   ;;  %vm132_vm5 = vcmask 64512   ;;  %vm135_vm6 = vcmask 97280   ;;  %s1026_s0 = inlined_call_operand.vmem [shape: f32[34,4], index: 0, kind: input, shape index: {}]   ;;  %s1027_s1 = inlined_call_operand.vmem [shape: bf16[16,16], index: 1, kind: input, shape index: {}]   ;;  %s1028_s3 = inlined_call_operand.vmem [shape: f32[2,16], index: 3, kind: input, shape index: {}, may-alias: {3,8}]   ;;  %s1029_s2 = inlined_call_operand.vmem [shape: bf16[32,8], index: 2, kind: input, shape index: {}]   ;;  %s1030_s4 = inlined_call_operand.vmem [shape: f32[2,8], index: 4, kind: input, shape index: {}]   ;;  %s1031_s5 = inlined_call_operand.vmem [shape: bf16[32,32], index: 5, kind: input, shape index: {}]   ;;  %s1032_s7 = inlined_call_operand.vmem [shape: f32[2,32], index: 7, kind: input, shape index: {}]   ;;  %s1033_s6 = inlined_call_operand.vmem [shape: bf16[64,16], index: 6, kind: input, shape index: {}]   ;;  %s1034_s8 = inlined_call_operand.vmem [shape: f32[2,16], index: 8, kind: input, shape index: {}, may-alias: {3,8}]   ;;  %s1035_s9 = inlined_call_operand.vmem [shape: f32[8,16], index: 9, kind: input, shape index: {}]   ;;  %s1036_s10 = inlined_call_operand.vmem [shape: f32[2,8], index: 10, kind: input, shape index: {}]   ;;  %s1037_s11 = inlined_call_operand.vmem [shape: f32[2,1], index: 11, kind: output, shape index: {}]  }
   0x1   :  { %v705_v1 = vld [vmem:[%s1026_s0 + $0x1] ss:$2 sm:$0xff]  ;;  %v706_v2 = vld [vmem:[%s1026_s0 + $0x11] ss:$2 sm:$0xff]  ;;  %v707_v8 = vld [vmem:[%s1026_s0 + $0x2] ss:$2 sm:$0xff] }
   0x2   :  { %v772_v3 = vpack.i.bf16 %v706_v2, %v705_v1  ;;  %v890_v4 = vshrl.u32 %v47_v0, 7  ;;  %v709_v7 = vld [vmem:[%s1026_s0 + $0x3] ss:$2 sm:$0xff]  ;;  %v708_v9 = vld [vmem:[%s1026_s0 + $0x12] ss:$2 sm:$0xff]  ;;  %s816_s12 = smov 12  }
   0x3   :  { %v710_v11 = vld [vmem:[%s1026_s0 + $0x13] ss:$2 sm:$0xff]  ;;  %v777_v13 = vpack.i.bf16 %v708_v9, %v707_v8  ;;  %v74_v18 = vld [vmem:[%s1026_s0] ss:$2 sm:$0xff]  ;;  %v704_v19 = vld [vmem:[%s1026_s0 + $0x10] ss:$2 sm:$0xff] }
   0x4   :  { %773 = vrot.lane.b32.xlu0 %v772_v3, %s814_s21  ;;  %v49_v5 = vadd.s32 8, %v890_v4  ;;  %v894_v6 = vand.u32 7, %v890_v4  ;;  %v753_v16 = vld [vmem:[%s1027_s1] sm:$0xff]  ;;  %vm145_vm7 = vcmask 130048   ;;  %vm235_vm13 = vcmp.lt.s32.totalorder %v890_v4, 7  ;;  %s818_s19 = smov 16  }
   0x5   :  { %156 = vmatpush.bf16.msra.mxu0 %v753_v16  ;;  %vm216_vm14 = vcmp.lt.s32.totalorder %v890_v4, 1  ;;  %s819_s20 = smov 24  }
   0x6   :  { %v905_v10 = vand.u32 7, %v49_v5  ;;  %vm97_vm0 = vcmp.eq.s32.totalorder %v894_v6, 7  ;;  %vm77_vm2 = vcmp.eq.s32.totalorder %v894_v6, 0  ;;  %v45_v5 = vld [vmem:[%s1028_s3] sm:$0x3]  ;;  %s817_s3 = smov 120  }
   0x7   :  { %v103_v12 = vsel %vm97_vm0, 0.0, %v709_v7  ;;  %v83_v22 = vsel %vm77_vm2, 0.0, %v74_v18  ;;  %v205_v16 = vperm.slane %v45_v5, 1 }
   0x8   :  { %vm98_vm1 = vcmp.eq.s32.totalorder %v905_v10, 7  ;;  %vm78_vm3 = vcmp.eq.s32.totalorder %v905_v10, 0 }
   0x9   :  { %v104_v14 = vsel %vm98_vm1, 0.0, %v710_v11  ;;  %v84_v23 = vsel %vm78_vm3, 0.0, %v704_v19  ;;  %vm254_vm1 = vcmp.lt.s32.totalorder %v890_v4, 6 }
   0xa   :  { %v782_v15 = vpack.i.bf16 %v104_v14, %v103_v12  ;;  %v202_v12 = vperm.slane %v45_v5, 0 }
   0xc   :  { %778 = vrot.lane.b32.xlu0 %v777_v13, %s815_s30  ;;  %783 = vrot.lane.b32.xlu1 %v782_v15, %s816_s12  ;;  %s823_s12 = smov 112  }
  0x76   :  { %v774_v17 = vpop.permute.xlu0 %773 }
  0x77   :  { %v776_v20 = vunpack.i.h.bf16 %v774_v17  ;;  %v775_v21 = vunpack.i.l.bf16 %v774_v17 }
  0x79   :  { %v130_v30 = vsel %vm129_vm4, %v83_v22, %v775_v21  ;;  %v131_v31 = vsel %vm129_vm4, %v84_v23, %v776_v20  ;;  %v238_v21 = vadd.s32 1, %v894_v6  ;;  %v239_v22 = vadd.s32 1, %v905_v10 }
  0x7b   :  { %vm242_vm15 = vcmp.lt.s32.totalorder %v238_v21, 8  ;;  %vm243_vm0 = vcmp.lt.s32.totalorder %v239_v22, 8 }
  0x7e   :  { %v779_v24 = vpop.permute.xlu0 %778  ;;  %v784_v25 = vpop.permute.xlu1 %783 }
  0x7f   :  { %v781_v26 = vunpack.i.h.bf16 %v779_v24  ;;  %v780_v27 = vunpack.i.l.bf16 %v779_v24  ;;  %v786_v28 = vunpack.i.h.bf16 %v784_v25  ;;  %v785_v29 = vunpack.i.l.bf16 %v784_v25 }
  0x81   :  { %v133_v32 = vsel %vm132_vm5, %v130_v30, %v780_v27  ;;  %v134_v33 = vsel %vm132_vm5, %v131_v31, %v781_v26 }
  0x82   :  { %v136_v34 = vsel %vm135_vm6, %v133_v32, %v785_v29  ;;  %v137_v35 = vsel %vm135_vm6, %v134_v33, %v786_v28  ;;  %v257_v32 = vadd.s32 2, %v894_v6  ;;  %v258_v33 = vadd.s32 2, %v905_v10 }
  0x83   :  { %v138_v36 = vpack.c.bf16 %v137_v35, %v136_v34 }
  0x84   :  { %vm261_vm2 = vcmp.lt.s32.totalorder %v257_v32, 8  ;;  %vm262_vm3 = vcmp.lt.s32.totalorder %v258_v33, 8 }
  0x85   :  { %715 = vmatmul.msk.bf16.vlgmr.msra.gmra.mxu0 %vm145_vm7, %v138_v36 }
 0x102   :  { %v158_v37 = vpop.f32.mrf.mxu0 }
 0x103   :  { %v173_v38 = vmul.f32 %v158_v37, %v158_v37  ;;  %v163_v40 = vsel %vm145_vm7, %v158_v37, 0.0 }
 0x105   :  { %v175_v44 = vsel %vm145_vm7, %v173_v38, 0.0 }
 0x10a   :  { %v160_v39 = vpop.f32.mrf.mxu0 }
 0x10b   :  { %v164_v41 = vsel %vm145_vm7, %v160_v39, 0.0  ;;  %v174_v42 = vmul.f32 %v160_v39, %v160_v39 }
 0x10c   :  { %v165_v43 = vadd.f32 %v164_v41, %v163_v40 }
 0x10d   :  { %v176_v45 = vsel %vm145_vm7, %v174_v42, 0.0 }
 0x10e   :  { %v166_v46 = vrot.slane %v165_v43, 4  ;;  %v177_v47 = vadd.f32 %v176_v45, %v175_v44 }
 0x110   :  { %v167_v48 = vadd.f32 %v166_v46, %v165_v43  ;;  %v178_v49 = vrot.slane %v177_v47, 4 }
 0x112   :  { %v168_v50 = vrot.slane %v167_v48, 2  ;;  %v179_v51 = vadd.f32 %v178_v49, %v177_v47  ;;  %v754_v49 = vld [vmem:[%s1029_s2] sm:$0xff] }
 0x114   :  { %v169_v52 = vadd.f32 %v168_v50, %v167_v48  ;;  %v180_v53 = vrot.slane %v179_v51, 2  ;;  %v755_v48 = vld [vmem:[%s1029_s2 + $0x8] sm:$0xff] }
 0x115   :  { %325 = vmatpush.bf16.msra.mxu1 %v755_v48 }
 0x116   :  { %v170_v54 = vrot.slane %v169_v52, 1  ;;  %v181_v55 = vadd.f32 %v180_v53, %v179_v51  ;;  %v219_v51 = vadd.s32 4294967295, %v894_v6 }
 0x118   :  { %v171_v56 = vadd.f32 %v170_v54, %v169_v52  ;;  %v182_v57 = vrot.slane %v181_v55, 1  ;;  %v220_v52 = vadd.s32 4294967295, %v905_v10  ;;  %vm221_vm4 = vcmp.ge.s32.totalorder %v219_v51, 0 }
 0x119   :  { %326 = vmatpush.bf16.msra.mxu1 %v754_v49 }
 0x11a   :  { %v172_v58 = vmul.f32 0.0625, %v171_v56  ;;  %v183_v59 = vadd.f32 %v182_v57, %v181_v55  ;;  %vm222_vm6 = vcmp.ge.s32.totalorder %v220_v52, 0 }
 0x11c   :  { %v184_v60 = vmul.f32 0.0625, %v183_v59  ;;  %v185_v61 = vmul.f32 %v172_v58, %v172_v58  ;;  %v187_v9 = vsub.f32 %v158_v37, %v172_v58  ;;  %v188_v11 = vsub.f32 %v160_v39, %v172_v58 }
 0x11e   :  { %v186_v62 = vsub.f32 %v184_v60, %v185_v61 }
 0x120   :  { %v189_v63 = vadd.f32 1e-05, %v186_v62 }
 0x122   :  { %802 = vrsqrt.f32 %v189_v63  ;;  %vm196_vm9 = vweird.f32 %v189_v63 }
 0x128   :  { %v803_v0 = vpop.eup %802 }
 0x129   :  { %v191_v1 = vmul.f32 %v803_v0, %v189_v63  ;;  %vm197_vm8 = vweird.f32 %v803_v0 }
 0x12a   :  { %vm198_vm10 = vmor %vm196_vm9, %vm197_vm8  ;;  %vm299_vm8 = vcmask 195584   ;;  %vm315_vm9 = vcmask 261120  }
 0x12b   :  { %v192_v2 = vmul.f32 %v803_v0, %v191_v1 }
 0x12d   :  { %v193_v3 = vmul.f32 0.5, %v192_v2 }
 0x12f   :  { %v194_v7 = vsub.f32 1.5, %v193_v3 }
 0x131   :  { %v195_v8 = vmul.f32 %v803_v0, %v194_v7 }
 0x133   :  { %v199_v13 = vsel %vm198_vm10, %v803_v0, %v195_v8  ;;  %vm394_vm10 = vcmask 57344  }
 0x134   :  { %v200_v14 = vmul.f32 %v199_v13, %v187_v9  ;;  %v201_v15 = vmul.f32 %v199_v13, %v188_v11 }
 0x136   :  { %v204_v17 = vmul.f32 %v202_v12, %v201_v15  ;;  %v203_v18 = vmul.f32 %v202_v12, %v200_v14 }
 0x138   :  { %v207_v19 = vadd.f32 %v205_v16, %v204_v17  ;;  %v206_v20 = vadd.f32 %v205_v16, %v203_v18 }
 0x13a   :  { %380 = vrot.lane.b32.xlu0 %v206_v20, %s817_s3  ;;  %vm208_vm11 = vcmp.ge.f32.partialorder %v206_v20, 0.0  ;;  %vm209_vm12 = vcmp.ge.f32.partialorder %v207_v19, 0.0  ;;  %v210_v23 = vmul.f32 0.2, %v206_v20  ;;  %v211_v24 = vmul.f32 0.2, %v207_v19 }
 0x13c   :  { %v212_v25 = vsel %vm208_vm11, %v206_v20, %v210_v23  ;;  %v213_v26 = vsel %vm209_vm12, %v207_v19, %v211_v24 }
 0x13d   :  { %v215_v27 = vrot.slane %v213_v26, 7  ;;  %v787_v28 = vpack.i.bf16 %v213_v26, %v212_v25  ;;  %v214_v29 = vrot.slane %v212_v25, 7  ;;  %v233_v30 = vrot.slane %v212_v25, 1 }
 0x13e   :  { %v234_v31 = vrot.slane %v213_v26, 1  ;;  %v252_v38 = vrot.slane %v212_v25, 2  ;;  %v253_v39 = vrot.slane %v213_v26, 2 }
 0x13f   :  { %788 = vrot.lane.b32.xlu1 %v787_v28, %s815_s30  ;;  %v217_v34 = vsel %vm216_vm14, %v214_v29, %v215_v27  ;;  %v218_v35 = vsel %vm216_vm14, %v215_v27, %v214_v29 }
 0x140   :  { %v236_v36 = vsel %vm235_vm13, %v233_v30, %v234_v31  ;;  %v237_v37 = vsel %vm235_vm13, %v234_v31, %v233_v30  ;;  %v255_v43 = vsel %vm254_vm1, %v252_v38, %v253_v39  ;;  %v256_v44 = vsel %vm254_vm1, %v253_v39, %v252_v38  ;;  %v46_v39 = vld [vmem:[%s1030_s4] sm:$0x3] }
 0x141   :  { %v250_v40 = vsel %vm242_vm15, %v236_v36, 0.0  ;;  %v251_v41 = vsel %vm243_vm0, %v237_v37, 0.0  ;;  %v269_v45 = vsel %vm261_vm2, %v255_v43, 0.0  ;;  %v270_v46 = vsel %vm262_vm3, %v256_v44, 0.0 }
 0x142   :  { %v792_v42 = vpack.i.bf16 %v251_v41, %v250_v40  ;;  %v797_v47 = vpack.i.bf16 %v270_v46, %v269_v45  ;;  %v231_v57 = vsel %vm221_vm4, %v218_v35, 0.0  ;;  %v232_v60 = vsel %vm222_vm6, %v217_v34, 0.0 }
 0x143   :  { %v820_v34 = vmov 0.0   ;;  %v372_v44 = vperm.slane %v46_v39, 0  ;;  %v375_v48 = vperm.slane %v46_v39, 1  ;;  %v411_v39 = vld [vmem:[%s1032_s7] sm:$0x3]  ;;  %s821_s7 = smov 48  }
 0x144   :  { %793 = vrot.lane.b32.xlu2 %v792_v42, %s818_s19  ;;  %395 = vst.msk [vmem:[#allocation2] sm:$0x1] %vm394_vm10, %v820_v34 }
 0x145   :  { %396 = vst.msk [vmem:[#allocation2 + $0x11] sm:$0x1] %vm394_vm10, %v820_v34 }
 0x147   :  { %382 = vrot.lane.b32.xlu1 %v207_v19, %s817_s3 }
 0x14c   :  { %798 = vrot.lane.b32.xlu2 %v797_v47, %s819_s20 }
 0x19e   :  { %v794_v50 = vpop.permute.xlu2 %793 }
 0x19f   :  { %v796_v58 = vunpack.i.h.bf16 %v794_v50  ;;  %v795_v59 = vunpack.i.l.bf16 %v794_v50 }
 0x1a6   :  { %v799_v53 = vpop.permute.xlu2 %798 }
 0x1a7   :  { %v801_v61 = vunpack.i.h.bf16 %v799_v53  ;;  %v800_v62 = vunpack.i.l.bf16 %v799_v53 }
 0x1ac   :  { %v381_v53 = vpop.permute.xlu0 %380 }
 0x1b1   :  { %v789_v54 = vpop.permute.xlu1 %788 }
 0x1b2   :  { %v791_v55 = vunpack.i.h.bf16 %v789_v54  ;;  %v790_v56 = vunpack.i.l.bf16 %v789_v54 }
 0x1b4   :  { %v295_v63 = vsel %vm132_vm5, %v231_v57, %v790_v56  ;;  %v296_v0 = vsel %vm132_vm5, %v232_v60, %v791_v55 }
 0x1b5   :  { %v297_v6 = vsel %vm145_vm7, %v295_v63, %v795_v59  ;;  %v298_v10 = vsel %vm145_vm7, %v296_v0, %v796_v58 }
 0x1b6   :  { %v300_v1 = vsel %vm299_vm8, %v297_v6, %v800_v62  ;;  %v301_v2 = vsel %vm299_vm8, %v298_v10, %v801_v61  ;;  %v971_v61 = vand.u32 3, %v890_v4  ;;  %v757_v10 = vld [vmem:[%s1031_s5 + $0x8] sm:$0xff]  ;;  %v756_v4 = vld [vmem:[%s1031_s5] sm:$0xff] }
 0x1b7   :  { %v302_v3 = vpack.c.bf16 %v301_v2, %v300_v1  ;;  %477 = vmatpush.bf16.msra.mxu2 %v757_v10 }
 0x1b8   :  { %vm436_vm0 = vcmp.eq.s32.totalorder %v971_v61, 3  ;;  %vm426_vm1 = vcmp.eq.s32.totalorder %v971_v61, 0 }
 0x1b9   :  { %724 = vmatmul.msk.bf16.vlgmr.msra.gmra.mxu1 %vm315_vm9, %v302_v3  ;;  %v383_v54 = vpop.permute.xlu1 %382 }
 0x1bb   :  { %478 = vmatpush.bf16.msra.mxu2 %v756_v4 }
 0x236   :  { %v328_v5 = vpop.f32.mrf.mxu1 }
 0x237   :  { %v343_v7 = vmul.f32 %v328_v5, %v328_v5  ;;  %v333_v9 = vsel %vm132_vm5, %v328_v5, 0.0 }
 0x239   :  { %v345_v14 = vsel %vm132_vm5, %v343_v7, 0.0 }
 0x23e   :  { %v330_v8 = vpop.f32.mrf.mxu1 }
 0x23f   :  { %v334_v11 = vsel %vm132_vm5, %v330_v8, 0.0  ;;  %v344_v12 = vmul.f32 %v330_v8, %v330_v8 }
 0x240   :  { %v335_v13 = vadd.f32 %v334_v11, %v333_v9 }
 0x241   :  { %v346_v15 = vsel %vm132_vm5, %v344_v12, 0.0 }
 0x242   :  { %v336_v16 = vrot.slane %v335_v13, 4  ;;  %v347_v17 = vadd.f32 %v346_v15, %v345_v14 }
 0x244   :  { %v337_v18 = vadd.f32 %v336_v16, %v335_v13  ;;  %v348_v19 = vrot.slane %v347_v17, 4 }
 0x246   :  { %v338_v20 = vrot.slane %v337_v18, 2  ;;  %v349_v21 = vadd.f32 %v348_v19, %v347_v17 }
 0x248   :  { %v339_v22 = vadd.f32 %v338_v20, %v337_v18  ;;  %v350_v23 = vrot.slane %v349_v21, 2 }
 0x24a   :  { %v340_v24 = vrot.slane %v339_v22, 1  ;;  %v351_v25 = vadd.f32 %v350_v23, %v349_v21 }
 0x24c   :  { %v341_v26 = vadd.f32 %v340_v24, %v339_v22  ;;  %v352_v27 = vrot.slane %v351_v25, 1 }
 0x24e   :  { %v342_v28 = vmul.f32 0.0625, %v341_v26  ;;  %v353_v29 = vadd.f32 %v352_v27, %v351_v25 }
 0x250   :  { %v354_v30 = vmul.f32 0.0625, %v353_v29  ;;  %v355_v31 = vmul.f32 %v342_v28, %v342_v28  ;;  %v357_v42 = vsub.f32 %v328_v5, %v342_v28  ;;  %v358_v43 = vsub.f32 %v330_v8, %v342_v28 }
 0x252   :  { %v356_v32 = vsub.f32 %v354_v30, %v355_v31 }
 0x254   :  { %v359_v33 = vadd.f32 1e-05, %v356_v32 }
 0x256   :  { %804 = vrsqrt.f32 %v359_v33  ;;  %vm366_vm12 = vweird.f32 %v359_v33 }
 0x25c   :  { %v805_v35 = vpop.eup %804 }
 0x25d   :  { %v361_v36 = vmul.f32 %v805_v35, %v359_v33  ;;  %vm367_vm11 = vweird.f32 %v805_v35 }
 0x25e   :  { %vm368_vm13 = vmor %vm366_vm12, %vm367_vm11  ;;  %vm561_vm12 = vcmask 392192  }
 0x25f   :  { %v362_v37 = vmul.f32 %v805_v35, %v361_v36 }
 0x261   :  { %v363_v38 = vmul.f32 0.5, %v362_v37 }
 0x263   :  { %v364_v40 = vsub.f32 1.5, %v363_v38 }
 0x265   :  { %v365_v41 = vmul.f32 %v805_v35, %v364_v40 }
 0x267   :  { %v369_v45 = vsel %vm368_vm13, %v805_v35, %v365_v41  ;;  %vm588_vm13 = vcmask 523264  }
 0x268   :  { %v370_v46 = vmul.f32 %v369_v45, %v357_v42  ;;  %v371_v47 = vmul.f32 %v369_v45, %v358_v43  ;;  %v516_v43 = vperm.slane %v411_v39, 0 }
 0x26a   :  { %v373_v49 = vmul.f32 %v372_v44, %v370_v46  ;;  %v374_v50 = vmul.f32 %v372_v44, %v371_v47  ;;  %v518_v46 = vperm.slane %v411_v39, 1 }
 0x26c   :  { %v376_v51 = vadd.f32 %v375_v48, %v373_v49  ;;  %v377_v52 = vadd.f32 %v375_v48, %v374_v50  ;;  %v540_v49 = vadd.s32 2, %v971_v61  ;;  %v532_v50 = vadd.s32 1, %v971_v61 }
 0x26e   :  { %v386_v55 = vadd.f32 %v381_v53, %v376_v51  ;;  %v387_v56 = vadd.f32 %v383_v54, %v377_v52  ;;  %vm534_vm10 = vcmp.lt.s32.totalorder %v532_v50, 4 }
 0x270   :  { %vm388_vm14 = vcmp.ge.f32.partialorder %v386_v55, 0.0  ;;  %vm389_vm15 = vcmp.ge.f32.partialorder %v387_v56, 0.0  ;;  %v390_v57 = vmul.f32 0.2, %v386_v55  ;;  %v391_v58 = vmul.f32 0.2, %v387_v56 }
 0x272   :  { %v392_v59 = vsel %vm388_vm14, %v386_v55, %v390_v57  ;;  %v393_v60 = vsel %vm389_vm15, %v387_v56, %v391_v58  ;;  %v761_v57 = vld [vmem:[%s1033_s6 + $0x18] sm:$0xff]  ;;  %v760_v58 = vld [vmem:[%s1033_s6 + $0x10] sm:$0xff] }
 0x273   :  { %397 = vst.msk [vmem:[#allocation2 + $0x1] sm:$0xff] %vm132_vm5, %v392_v59  ;;  %596 = vmatpush.bf16.msra.mxu3 %v761_v57  ;;  %v759_v59 = vld [vmem:[%s1033_s6 + $0x8] sm:$0xff] }
 0x274   :  { %398 = vst.msk [vmem:[#allocation2 + $0x9] sm:$0xff] %vm132_vm5, %v393_v60  ;;  %v758_v60 = vld [vmem:[%s1033_s6] sm:$0xff] }
 0x277   :  { %597 = vmatpush.bf16.msra.mxu3 %v760_v58 }
 0x27b   :  { %v433_v62 = vld [vmem:[#allocation2 + $0x2] ss:$2 sm:$0xff]  ;;  %v431_v63 = vld [vmem:[#allocation2 + $0x1] ss:$2 sm:$0xff]  ;;  %598 = vmatpush.bf16.msra.mxu3 %v759_v59 }
 0x27c   :  { %v435_v0 = vld [vmem:[#allocation2 + $0x3] ss:$2 sm:$0xff]  ;;  %445 = vrot.lane.b32.xlu0 %v433_v62, %s818_s19  ;;  %441 = vrot.lane.b32.xlu2 %v431_v63, %s815_s30  ;;  %v425_v1 = vld [vmem:[#allocation2] ss:$2 sm:$0xff]  ;;  %s822_s30 = smov 32   ;;  %v524_v62 = vadd.s32 4294967295, %v971_v61 }
 0x27d   :  { %v439_v6 = vsel %vm436_vm0, 0.0, %v435_v0  ;;  %v429_v3 = vsel %vm426_vm1, 0.0, %v425_v1  ;;  %vm675_vm0 = vcmask 123904  }
 0x27e   :  { %449 = vrot.lane.b32.xlu1 %v439_v6, %s819_s20  ;;  %vm525_vm11 = vcmp.ge.s32.totalorder %v524_v62, 0 }
 0x27f   :  { %599 = vmatpush.bf16.msra.mxu3 %v758_v60 }
 0x2d6   :  { %v442_v2 = vpop.permute.xlu2 %441 }
 0x2d7   :  { %v452_v5 = vsel %vm132_vm5, %v429_v3, %v442_v2 }
 0x2ee   :  { %v446_v7 = vpop.permute.xlu0 %445 }
 0x2ef   :  { %v453_v8 = vsel %vm145_vm7, %v452_v5, %v446_v7 }
 0x2f0   :  { %v450_v9 = vpop.permute.xlu1 %449 }
 0x2f1   :  { %v454_v11 = vsel %vm299_vm8, %v453_v8, %v450_v9  ;;  %vm542_vm8 = vcmp.lt.s32.totalorder %v540_v49, 4  ;;  %v651_v49 = vld [vmem:[%s1036_s10] sm:$0x3] }
 0x2f2   :  { %v455_v12 = vpack.c.bf16 %v454_v11, %v454_v11 }
 0x2f4   :  { %733 = vmatmul.msk.bf16.vlgmr.msra.gmra.mxu2 %vm315_vm9, %v455_v12 }
 0x377   :  { %v480_v13 = vpop.f32.mrf.mxu2 }
 0x378   :  { %v484_v14 = vsel %vm315_vm9, %v480_v13, 0.0  ;;  %v492_v15 = vmul.f32 %v480_v13, %v480_v13 }
 0x379   :  { %v485_v16 = vrot.slane %v484_v14, 4 }
 0x37a   :  { %v493_v17 = vsel %vm315_vm9, %v492_v15, 0.0 }
 0x37b   :  { %v486_v18 = vadd.f32 %v485_v16, %v484_v14  ;;  %v494_v19 = vrot.slane %v493_v17, 4 }
 0x37d   :  { %v487_v20 = vrot.slane %v486_v18, 2  ;;  %v495_v21 = vadd.f32 %v494_v19, %v493_v17 }
 0x37f   :  { %v488_v22 = vadd.f32 %v487_v20, %v486_v18  ;;  %v496_v23 = vrot.slane %v495_v21, 2  ;;  %v482_v24 = vpop.f32.mrf.mxu2 }
 0x381   :  { %v489_v25 = vrot.slane %v488_v22, 1  ;;  %v497_v26 = vadd.f32 %v496_v23, %v495_v21 }
 0x383   :  { %v490_v27 = vadd.f32 %v489_v25, %v488_v22  ;;  %v498_v28 = vrot.slane %v497_v26, 1 }
 0x385   :  { %v491_v29 = vmul.f32 0.125, %v490_v27  ;;  %v499_v30 = vadd.f32 %v498_v28, %v497_v26 }
 0x387   :  { %v500_v31 = vmul.f32 0.125, %v499_v30  ;;  %v501_v32 = vmul.f32 %v491_v29, %v491_v29  ;;  %v503_v42 = vsub.f32 %v480_v13, %v491_v29 }
 0x389   :  { %v502_v33 = vsub.f32 %v500_v31, %v501_v32 }
 0x38b   :  { %v504_v34 = vadd.f32 1e-05, %v502_v33  ;;  %v412_v33 = vld [vmem:[%s1034_s8] sm:$0x3] }
 0x38d   :  { %806 = vrsqrt.f32 %v504_v34  ;;  %vm511_vm3 = vweird.f32 %v504_v34 }
 0x393   :  { %v807_v35 = vpop.eup %806 }
 0x394   :  { %v506_v36 = vmul.f32 %v807_v35, %v504_v34  ;;  %vm512_vm2 = vweird.f32 %v807_v35 }
 0x395   :  { %vm513_vm4 = vmor %vm511_vm3, %vm512_vm2 }
 0x396   :  { %v507_v37 = vmul.f32 %v807_v35, %v506_v36 }
 0x398   :  { %v508_v38 = vmul.f32 0.5, %v507_v37  ;;  %v637_v37 = vperm.slane %v412_v33, 0 }
 0x39a   :  { %v509_v40 = vsub.f32 1.5, %v508_v38 }
 0x39c   :  { %v510_v41 = vmul.f32 %v807_v35, %v509_v40  ;;  %v639_v40 = vperm.slane %v412_v33, 1 }
 0x39e   :  { %v514_v44 = vsel %vm513_vm4, %v807_v35, %v510_v41 }
 0x39f   :  { %v515_v45 = vmul.f32 %v514_v44, %v503_v42 }
 0x3a1   :  { %v517_v47 = vmul.f32 %v516_v43, %v515_v45 }
 0x3a3   :  { %v519_v48 = vadd.f32 %v518_v46, %v517_v47  ;;  %v649_v46 = vld [vmem:[%s1035_s9] sm:$0xff] }
 0x3a5   :  { %vm520_vm6 = vcmp.ge.f32.partialorder %v519_v48, 0.0  ;;  %v521_v51 = vmul.f32 0.2, %v519_v48 }
 0x3a7   :  { %v522_v52 = vsel %vm520_vm6, %v519_v48, %v521_v51 }
 0x3a8   :  { %548 = vrot.lane.b32.xlu2 %v522_v52, %s818_s19  ;;  %v539_v53 = vrot.slane %v522_v52, 2  ;;  %v531_v54 = vrot.slane %v522_v52, 1  ;;  %v523_v63 = vrot.slane %v522_v52, 7 }
 0x3aa   :  { %v546_v55 = vsel %vm542_vm8, %v539_v53, 0.0  ;;  %v538_v56 = vsel %vm534_vm10, %v531_v54, 0.0  ;;  %v530_v6 = vsel %vm525_vm11, %v523_v63, 0.0 }
 0x3ab   :  { %556 = vrot.lane.b32.xlu1 %v546_v55, %s821_s7  ;;  %552 = vrot.lane.b32.xlu0 %v538_v56, %s822_s30 }
 0x3b0   :  { %642 = vrot.lane.b32.xlu2 %v519_v48, %s823_s12 }
 0x402   :  { %v549_v0 = vpop.permute.xlu2 %548 }
 0x403   :  { %v559_v10 = vsel %vm145_vm7, %v530_v6, %v549_v0 }
 0x40a   :  { %v643_v43 = vpop.permute.xlu2 %642 }
 0x41d   :  { %v557_v4 = vpop.permute.xlu1 %556  ;;  %v553_v1 = vpop.permute.xlu0 %552 }
 0x41e   :  { %v560_v2 = vsel %vm315_vm9, %v559_v10, %v553_v1 }
 0x41f   :  { %v562_v3 = vsel %vm561_vm12, %v560_v2, %v557_v4 }
 0x420   :  { %v563_v5 = vpack.c.bf16 %v562_v3, %v562_v3 }
 0x422   :  { %750 = vmatmul.msk.bf16.vlgmr.msra.gmra.mxu3 %vm588_vm13, %v563_v5 }
 0x4a5   :  { %v601_v7 = vpop.f32.mrf.mxu3 }
 0x4a6   :  { %v605_v8 = vsel %vm145_vm7, %v601_v7, 0.0  ;;  %v613_v9 = vmul.f32 %v601_v7, %v601_v7 }
 0x4a7   :  { %v606_v61 = vrot.slane %v605_v8, 4 }
 0x4a8   :  { %v614_v11 = vsel %vm145_vm7, %v613_v9, 0.0 }
 0x4a9   :  { %v607_v12 = vadd.f32 %v606_v61, %v605_v8  ;;  %v615_v13 = vrot.slane %v614_v11, 4 }
 0x4ab   :  { %v608_v14 = vrot.slane %v607_v12, 2  ;;  %v616_v15 = vadd.f32 %v615_v13, %v614_v11 }
 0x4ad   :  { %v609_v16 = vadd.f32 %v608_v14, %v607_v12  ;;  %v617_v17 = vrot.slane %v616_v15, 2  ;;  %v603_v18 = vpop.f32.mrf.mxu3 }
 0x4af   :  { %v610_v19 = vrot.slane %v609_v16, 1  ;;  %v618_v20 = vadd.f32 %v617_v17, %v616_v15 }
 0x4b1   :  { %v611_v21 = vadd.f32 %v610_v19, %v609_v16  ;;  %v619_v22 = vrot.slane %v618_v20, 1 }
 0x4b3   :  { %v612_v23 = vmul.f32 0.125, %v611_v21  ;;  %v620_v24 = vadd.f32 %v619_v22, %v618_v20 }
 0x4b5   :  { %v621_v25 = vmul.f32 0.125, %v620_v24  ;;  %v622_v26 = vmul.f32 %v612_v23, %v612_v23  ;;  %v624_v36 = vsub.f32 %v601_v7, %v612_v23 }
 0x4b7   :  { %v623_v27 = vsub.f32 %v621_v25, %v622_v26 }
 0x4b9   :  { %v625_v28 = vadd.f32 1e-05, %v623_v27 }
 0x4bb   :  { %808 = vrsqrt.f32 %v625_v28  ;;  %vm632_vm9 = vweird.f32 %v625_v28 }
 0x4c1   :  { %v809_v29 = vpop.eup %808 }
 0x4c2   :  { %v627_v30 = vmul.f32 %v809_v29, %v625_v28  ;;  %vm633_vm7 = vweird.f32 %v809_v29 }
 0x4c3   :  { %vm634_vm14 = vmor %vm632_vm9, %vm633_vm7 }
 0x4c4   :  { %v628_v31 = vmul.f32 %v809_v29, %v627_v30 }
 0x4c6   :  { %v629_v32 = vmul.f32 0.5, %v628_v31 }
 0x4c8   :  { %v630_v34 = vsub.f32 1.5, %v629_v32 }
 0x4ca   :  { %v631_v35 = vmul.f32 %v809_v29, %v630_v34 }
 0x4cc   :  { %v635_v38 = vsel %vm634_vm14, %v809_v29, %v631_v35 }
 0x4cd   :  { %v636_v39 = vmul.f32 %v635_v38, %v624_v36 }
 0x4cf   :  { %v638_v41 = vmul.f32 %v637_v37, %v636_v39 }
 0x4d1   :  { %v640_v42 = vadd.f32 %v639_v40, %v638_v41 }
 0x4d3   :  { %v645_v44 = vadd.f32 %v643_v43, %v640_v42 }
 0x4d5   :  { %vm646_vm15 = vcmp.ge.f32.partialorder %v645_v44, 0.0  ;;  %v647_v45 = vmul.f32 0.2, %v645_v44 }
 0x4d7   :  { %v648_v47 = vsel %vm646_vm15, %v645_v44, %v647_v45 }
 0x4d8   :  { %v650_v48 = vmul.f32 %v649_v46, %v648_v47 }
 0x4da   :  { %670 = vmatpush.msrb.mxu0 %v650_v48 }
 0x4db   :  { %751 = vmatmul.msk.f32.vlgmr.msrb.gmra.mxu0 %vm132_vm5, %v651_v49  ;;  %vm698_vm5 = vcmask 1024  }
 0x558   :  { %v672_v50 = vpop.f32.mrf.mxu0 }
 0x559   :  { %v676_v51 = vsel %vm675_vm0, %v672_v50, 0.0 }
 0x55a   :  { %677 = vadd.xlane.f32.xlu0 %v676_v51 }
 0x5cd   :  { %v678_v52 = vpop.xlane.xlu0 %677 }
 0x5ce   :  { %v752_v53 = vmul.f32 -1.442695, %v678_v52 }
 0x5d0   :  { %810 = vpow2.f32 %v752_v53 }
 0x5d6   :  { %v811_v54 = vpop.eup %810 }
 0x5d7   :  { %v682_v55 = vadd.f32 1.0, %v811_v54 }
 0x5d9   :  { %812 = vrcp.f32 %v682_v55  ;;  %v694_v59 = vand.u32 2147483648, %v682_v55  ;;  %v692_v62 = vand.u32 2147483647, %v682_v55  ;;  %vm688_vm2 = vweird.f32 %v682_v55 }
 0x5db   :  { %v695_v0 = vor.u32 1.1754944e-38, %v694_v59  ;;  %vm693_vm4 = vcmp.eq.f32.partialorder %v692_v62, 8.507059e+37 }
 0x5df   :  { %v813_v56 = vpop.eup %812 }
 0x5e0   :  { %v684_v57 = vmul.f32 %v813_v56, %v682_v55  ;;  %vm689_vm1 = vweird.f32 %v813_v56 }
 0x5e1   :  { %vm690_vm3 = vmor %vm688_vm2, %vm689_vm1 }
 0x5e2   :  { %v685_v58 = vsub.f32 1.0, %v684_v57 }
 0x5e4   :  { %v686_v60 = vmul.f32 %v813_v56, %v685_v58 }
 0x5e6   :  { %v687_v63 = vadd.f32 %v813_v56, %v686_v60 }
 0x5e8   :  { %v691_v6 = vsel %vm690_vm3, %v813_v56, %v687_v63 }
 0x5e9   :  { %v696_v10 = vsel %vm693_vm4, %v695_v0, %v691_v6 }
 0x5ea   :  { %699 = vst.msk [vmem:[%s1037_s11] sm:$0x3] %vm698_vm5, %v696_v10 }

</bundles_post_ra>
